<compile_context>
chip_gen: v5e
topology: v5e:2x2
jax: 0.10.0
libtpu: 0.0.40
codegen_flags: <defaults>
</compile_context>

<pallas_src>
import functools

import jax
import jax.numpy as jnp
from jax import lax
from jax.experimental import pallas as pl
from jax.experimental.pallas import tpu as pltpu

LANE = 128
SUBLANE = 8
MAX_TILE_R = 8192          # rows per DMA block: 8192 * 128 * 4 B = 4 MiB / input
MAX_CHUNK_R = 1024         # rows per inner compute chunk (~0.5 MiB temporaries)
SMALL_N = 1 << 18          # below this, fused XLA elementwise+reduce wins
VMEM_LIMIT_BYTES = 32 * 1024 * 1024


def _rmsle_kernel(pred_ref, actual_ref, out_ref, *, n_rows, tile_r, chunk):
    """Accumulate sum((log(p+1) - log(a+1))^2) into a resident (8,128) slab."""
    c = pl.program_id(0)                 # core-split axis
    i = pl.program_id(1)                 # row-tile (reduction) axis
    tiles_per_core = pl.num_programs(1)

    @pl.when(i == 0)
    def _():
        out_ref[...] = jnp.zeros_like(out_ref)

    row0 = (c * tiles_per_core + i) * tile_r      # first global row of block
    n_chunks = tile_r // chunk                    # static python int

    def block_sum(masked):
        def body(j, acc):
            r = pl.multiple_of(j * chunk, chunk)
            p = pred_ref[pl.ds(r, chunk), :].astype(jnp.float32)
            a = actual_ref[pl.ds(r, chunk), :].astype(jnp.float32)
            # Two EUP pushes + one VPU subtract (no f32 divide); literal
            # PyTorch formula log(x+1).
            d = jnp.log(p + 1.0) - jnp.log(a + 1.0)
            dd = d * d
            if masked:
                gids = (row0 + r) + lax.broadcasted_iota(
                    jnp.int32, (chunk, LANE), 0)
                # select (not multiply) so garbage rows (possibly NaN/inf
                # after log) are cleanly dropped.
                dd = jnp.where(gids < n_rows, dd, 0.0)
            # (chunk,128) -> (chunk//8, 8, 128): splits the sublane axis on a
            # native (8,128)-tile boundary, so no VMEM round trip; the sum
            # over axis 0 is pure VPU adds into one vreg.
            return acc + dd.reshape(chunk // SUBLANE, SUBLANE, LANE).sum(axis=0)

        return lax.fori_loop(0, n_chunks, body,
                             jnp.zeros((SUBLANE, LANE), jnp.float32))

    block_end = row0 + tile_r

    # Fast path: whole block in range -> no iota/compare/select work.
    @pl.when(block_end <= n_rows)
    def _():
        out_ref[0] += block_sum(masked=False)

    # Boundary block (at most one per core): mask rows >= n_rows.
    @pl.when(jnp.logical_and(row0 < n_rows, block_end > n_rows))
    def _():
        out_ref[0] += block_sum(masked=True)

    # Fully out-of-range clamped duplicate blocks (odd tile count split across
    # cores) fall through both branches and contribute nothing.


@functools.lru_cache(maxsize=None)
def _two_core_split() -> bool:
    # Only v7x has 2 TensorCores per chip, and only CORE_PARALLEL actually
    # shards a grid axis across them ("parallel" alone does not).
    if not hasattr(pltpu, "CORE_PARALLEL"):
        return False
    try:
        kind = jax.devices()[0].device_kind.lower()
    except Exception:
        return False
    return ("v7" in kind) or ("7x" in kind)


def _largest_chunk(tile_r: int) -> int:
    for cand in (MAX_CHUNK_R, 512, 256, 128, 64, 32, 16, 8):
        if tile_r % cand == 0:
            return cand
    return tile_r  # unreachable: tile_r is always a multiple of 8


def _pallas_partials(p2, a2, *, rows, nc, core_parallel):
    tile_r = min(MAX_TILE_R, rows)                # both multiples of 8
    chunk = _largest_chunk(tile_r)
    tiles_total = -(-rows // tile_r)
    tiles_per_core = -(-tiles_total // nc)
    grid = (nc, tiles_per_core)

    def in_map(c, i):
        # Clamp so the DMA window always stays inside the array; logically
        # out-of-range blocks are skipped / masked inside the kernel.
        return (jnp.minimum(c * tiles_per_core + i, tiles_total - 1), 0)

    sem0 = pltpu.CORE_PARALLEL if core_parallel else pltpu.ARBITRARY

    return pl.pallas_call(
        functools.partial(_rmsle_kernel, n_rows=rows, tile_r=tile_r, chunk=chunk),
        out_shape=jax.ShapeDtypeStruct((nc, SUBLANE, LANE), jnp.float32),
        grid_spec=pltpu.PrefetchScalarGridSpec(
            num_scalar_prefetch=0,
            grid=grid,
            in_specs=[
                pl.BlockSpec((tile_r, LANE), in_map),
                pl.BlockSpec((tile_r, LANE), in_map),
            ],
            out_specs=pl.BlockSpec((1, SUBLANE, LANE), lambda c, i: (c, 0, 0)),
        ),
        compiler_params=pltpu.CompilerParams(
            dimension_semantics=(sem0, pltpu.ARBITRARY),
            vmem_limit_bytes=VMEM_LIMIT_BYTES,
        ),
    )(p2, a2)


def rmsle_loss(pred, actual, *, min_pallas_elements=SMALL_N):
    assert pred.shape == actual.shape
    n = pred.size
    assert n > 0

    # Small-input fast path: fused XLA elementwise+reduce beats a kernel launch.
    if n < min_pallas_elements:
        d = jnp.log(pred.astype(jnp.float32) + 1.0) - jnp.log(
            actual.astype(jnp.float32) + 1.0)
        return jnp.sqrt(jnp.sum(d * d) / n)

    flat_p = pred.reshape(-1)
    flat_a = actual.reshape(-1)

    # Main slab: largest prefix that is a whole number of (8,128) tiles.
    n_main = (n // (SUBLANE * LANE)) * (SUBLANE * LANE)
    total = jnp.float32(0.0)

    if n_main:
        rows = n_main // LANE                      # multiple of 8
        p2 = flat_p[:n_main].reshape(rows, LANE)
        a2 = flat_a[:n_main].reshape(rows, LANE)
        if _two_core_split():
            try:
                partials = _pallas_partials(p2, a2, rows=rows,
                                            nc=2, core_parallel=True)
            except Exception:
                partials = _pallas_partials(p2, a2, rows=rows,
                                            nc=1, core_parallel=False)
        else:
            partials = _pallas_partials(p2, a2, rows=rows,
                                        nc=1, core_parallel=False)
        total = total + jnp.sum(partials)

    # <=1023-element tail in plain JAX: avoids a full-tensor concatenate/pad
    # copy in HBM for the memory-bound main pass.
    if n_main < n:
        tp = flat_p[n_main:].astype(jnp.float32)
        ta = flat_a[n_main:].astype(jnp.float32)
        d = jnp.log(tp + 1.0) - jnp.log(ta + 1.0)
        total = total + jnp.sum(d * d)

    return jnp.sqrt(total / n)


if __name__ == "__main__":
    key = jax.random.PRNGKey(0)
    k1, k2, k3, k4 = jax.random.split(key, 4)

    def reference(p, a):
        return jnp.sqrt(jnp.mean((jnp.log(p + 1.0) - jnp.log(a + 1.0)) ** 2))

    # Small shape consistent with the training script; force the Pallas path
    # (bypass the small-input jnp fast path) so the kernel itself compiles and
    # runs on TPU.
    shape = (2, 4, 16, 16)
    pred = jax.random.uniform(k1, shape, dtype=jnp.float32) * 5.0 + 0.1
    actual = jax.random.uniform(k2, shape, dtype=jnp.float32) * 5.0 + 0.1
    loss = rmsle_loss(pred, actual, min_pallas_elements=0)
    jax.block_until_ready(loss)
    ref = reference(pred, actual)
    assert jnp.allclose(loss, ref, rtol=1e-5, atol=1e-6), (loss, ref)

    # Larger check: multi-tile grid, masked boundary block, non-lane-aligned
    # tail handled in plain JAX, default (auto) Pallas path.
    shape2 = (2, 75, 80, 100)          # 1,200,000 elements
    pred2 = jax.random.uniform(k3, shape2, dtype=jnp.float32) * 5.0 + 0.1
    actual2 = jax.random.uniform(k4, shape2, dtype=jnp.float32) * 5.0 + 0.1
    loss2 = rmsle_loss(pred2, actual2)
    jax.block_until_ready(loss2)
    ref2 = reference(pred2, actual2)
    assert jnp.allclose(loss2, ref2, rtol=2e-4, atol=1e-6), (loss2, ref2)

    print("KERNEL_OK")
</pallas_src>

<mosaic_0001>
module attributes {stable_mosaic.version = 11 : i64} {
  func.func @_rmsle_kernel(%arg0: i32, %arg1: i32, %arg2: memref<16x128xf32, #tpu.memory_space<vmem>>, %arg3: memref<16x128xf32, #tpu.memory_space<vmem>>, %arg4: memref<1x8x128xf32, #tpu.memory_space<vmem>>) attributes {dimension_semantics = [#tpu.dimension_semantics<arbitrary>, #tpu.dimension_semantics<arbitrary>], iteration_bounds = array<i64: 1, 1>, scalar_prefetch = 0 : i64, scratch_operands = 0 : i64, tpu.core_type = #tpu.core_type<tc>, window_params = [{transform_indices = @transform_0, window_bounds = array<i64: 16, 128>}, {transform_indices = @transform_1, window_bounds = array<i64: 16, 128>}, {transform_indices = @transform_2, window_bounds = array<i64: 1, 8, 128>}]} {
    %c0_i32 = arith.constant 0 : i32
    %0 = arith.cmpi eq, %arg1, %c0_i32 : i32
    %1 = arith.extui %0 : i1 to i32
    %c0_i32_0 = arith.constant 0 : i32
    %2 = arith.cmpi ne, %1, %c0_i32_0 : i32
    scf.if %2 {
      %cst = arith.constant 0.000000e+00 : f32
      %15 = vector.broadcast %cst : f32 to vector<1x8x128xf32>
      %c0 = arith.constant 0 : index
      %c0_7 = arith.constant 0 : index
      %c0_8 = arith.constant 0 : index
      %16 = vector.load %arg4[%c0, %c0_7, %c0_8] : memref<1x8x128xf32, #tpu.memory_space<vmem>>, vector<1x8x128xf32>
      tpu.vector_store %arg4[%c0, %c0_7, %c0_8], %15 {strides = array<i32>} : memref<1x8x128xf32, #tpu.memory_space<vmem>>, vector<1x8x128xf32>,
    } else {
    }
    %c1_i32 = arith.constant 1 : i32
    %3 = arith.muli %arg0, %c1_i32 : i32
    %4 = arith.addi %3, %arg1 : i32
    %c16_i32 = arith.constant 16 : i32
    %5 = arith.muli %4, %c16_i32 : i32
    %c16_i32_1 = arith.constant 16 : i32
    %6 = arith.addi %5, %c16_i32_1 : i32
    %c16_i32_2 = arith.constant 16 : i32
    %7 = arith.cmpi sle, %6, %c16_i32_2 : i32
    %8 = arith.extui %7 : i1 to i32
    %c0_i32_3 = arith.constant 0 : i32
    %9 = arith.cmpi ne, %8, %c0_i32_3 : i32
    scf.if %9 {
      %c0 = arith.constant 0 : index
      %c0_7 = arith.constant 0 : index
      %c0_8 = arith.constant 0 : index
      %15 = vector.load %arg4[%c0, %c0_7, %c0_8] : memref<1x8x128xf32, #tpu.memory_space<vmem>>, vector<1x8x128xf32>
      %16 = vector.shape_cast %15 : vector<1x8x128xf32> to vector<8x128xf32>
      %cst = arith.constant 0.000000e+00 : f32
      %17 = vector.broadcast %cst : f32 to vector<8x128xf32>
      %c0_i32_9 = arith.constant 0 : i32
      %c16_i32_10 = arith.constant 16 : i32
      %18 = arith.muli %c0_i32_9, %c16_i32_10 : i32
      %19 = tpu.assume_multiple %18, 16 : i32
      %20 = arith.index_cast %19 : i32 to index
      %c0_11 = arith.constant 0 : index
      %21 = vector.load %arg2[%20, %c0_11] : memref<16x128xf32, #tpu.memory_space<vmem>>, vector<16x128xf32>
      %22 = arith.index_cast %19 : i32 to index
      %c0_12 = arith.constant 0 : index
      %23 = vector.load %arg3[%22, %c0_12] : memref<16x128xf32, #tpu.memory_space<vmem>>, vector<16x128xf32>
      %cst_13 = arith.constant 1.000000e+00 : f32
      %24 = vector.broadcast %cst_13 : f32 to vector<16x128xf32>
      %25 = arith.addf %21, %24 : vector<16x128xf32>
      %26 = math.log %25 : vector<16x128xf32>
      %cst_14 = arith.constant 1.000000e+00 : f32
      %27 = vector.broadcast %cst_14 : f32 to vector<16x128xf32>
      %28 = arith.addf %23, %27 : vector<16x128xf32>
      %29 = math.log %28 : vector<16x128xf32>
      %30 = arith.subf %26, %29 : vector<16x128xf32>
      %31 = arith.mulf %30, %30 : vector<16x128xf32>
      %32 = vector.shape_cast %31 : vector<16x128xf32> to vector<2x8x128xf32>
      %cst_15 = arith.constant dense<0.000000e+00> : vector<8x128xf32>
      %33 = vector.multi_reduction <add>, %32, %cst_15 [0] : vector<2x8x128xf32> to vector<8x128xf32>
      %34 = arith.addf %17, %33 : vector<8x128xf32>
      %c1_i32_16 = arith.constant 1 : i32
      %35 = arith.addf %16, %34 : vector<8x128xf32>
      %c0_17 = arith.constant 0 : index
      %c0_18 = arith.constant 0 : index
      %c0_19 = arith.constant 0 : index
      %36 = vector.load %arg4[%c0_17, %c0_18, %c0_19] : memref<1x8x128xf32, #tpu.memory_space<vmem>>, vector<1x8x128xf32>
      %37 = vector.shape_cast %36 : vector<1x8x128xf32> to vector<8x128xf32>
      %38 = vector.shape_cast %35 : vector<8x128xf32> to vector<1x8x128xf32>
      tpu.vector_store %arg4[%c0_17, %c0_18, %c0_19], %38 {strides = array<i32>} : memref<1x8x128xf32, #tpu.memory_space<vmem>>, vector<1x8x128xf32>,
    } else {
    }
    %c16_i32_4 = arith.constant 16 : i32
    %10 = arith.cmpi slt, %5, %c16_i32_4 : i32
    %c16_i32_5 = arith.constant 16 : i32
    %11 = arith.cmpi sgt, %6, %c16_i32_5 : i32
    %12 = arith.andi %10, %11 : i1
    %13 = arith.extui %12 : i1 to i32
    %c0_i32_6 = arith.constant 0 : i32
    %14 = arith.cmpi ne, %13, %c0_i32_6 : i32
    scf.if %14 {
      %c0 = arith.constant 0 : index
      %c0_7 = arith.constant 0 : index
      %c0_8 = arith.constant 0 : index
      %15 = vector.load %arg4[%c0, %c0_7, %c0_8] : memref<1x8x128xf32, #tpu.memory_space<vmem>>, vector<1x8x128xf32>
      %16 = vector.shape_cast %15 : vector<1x8x128xf32> to vector<8x128xf32>
      %cst = arith.constant 0.000000e+00 : f32
      %17 = vector.broadcast %cst : f32 to vector<8x128xf32>
      %c0_i32_9 = arith.constant 0 : i32
      %c16_i32_10 = arith.constant 16 : i32
      %18 = arith.muli %c0_i32_9, %c16_i32_10 : i32
      %19 = tpu.assume_multiple %18, 16 : i32
      %20 = arith.index_cast %19 : i32 to index
      %c0_11 = arith.constant 0 : index
      %21 = vector.load %arg2[%20, %c0_11] : memref<16x128xf32, #tpu.memory_space<vmem>>, vector<16x128xf32>
      %22 = arith.index_cast %19 : i32 to index
      %c0_12 = arith.constant 0 : index
      %23 = vector.load %arg3[%22, %c0_12] : memref<16x128xf32, #tpu.memory_space<vmem>>, vector<16x128xf32>
      %cst_13 = arith.constant 1.000000e+00 : f32
      %24 = vector.broadcast %cst_13 : f32 to vector<16x128xf32>
      %25 = arith.addf %21, %24 : vector<16x128xf32>
      %26 = math.log %25 : vector<16x128xf32>
      %cst_14 = arith.constant 1.000000e+00 : f32
      %27 = vector.broadcast %cst_14 : f32 to vector<16x128xf32>
      %28 = arith.addf %23, %27 : vector<16x128xf32>
      %29 = math.log %28 : vector<16x128xf32>
      %30 = arith.subf %26, %29 : vector<16x128xf32>
      %31 = arith.mulf %30, %30 : vector<16x128xf32>
      %32 = arith.addi %5, %19 : i32
      %33 = tpu.iota {dimensions = array<i32: 0>} : vector<16x128xi32>
      %34 = vector.broadcast %32 : i32 to vector<16x128xi32>
      %35 = arith.addi %34, %33 : vector<16x128xi32>
      %c16_i32_15 = arith.constant 16 : i32
      %36 = vector.broadcast %c16_i32_15 : i32 to vector<16x128xi32>
      %37 = arith.cmpi slt, %35, %36 : vector<16x128xi32>
      %cst_16 = arith.constant 0.000000e+00 : f32
      %38 = vector.broadcast %cst_16 : f32 to vector<16x128xf32>
      %39 = arith.select %37, %31, %38 : vector<16x128xi1>, vector<16x128xf32>
      %40 = vector.shape_cast %39 : vector<16x128xf32> to vector<2x8x128xf32>
      %cst_17 = arith.constant dense<0.000000e+00> : vector<8x128xf32>
      %41 = vector.multi_reduction <add>, %40, %cst_17 [0] : vector<2x8x128xf32> to vector<8x128xf32>
      %42 = arith.addf %17, %41 : vector<8x128xf32>
      %c1_i32_18 = arith.constant 1 : i32
      %43 = arith.addf %16, %42 : vector<8x128xf32>
      %c0_19 = arith.constant 0 : index
      %c0_20 = arith.constant 0 : index
      %c0_21 = arith.constant 0 : index
      %44 = vector.load %arg4[%c0_19, %c0_20, %c0_21] : memref<1x8x128xf32, #tpu.memory_space<vmem>>, vector<1x8x128xf32>
      %45 = vector.shape_cast %44 : vector<1x8x128xf32> to vector<8x128xf32>
      %46 = vector.shape_cast %43 : vector<8x128xf32> to vector<1x8x128xf32>
      tpu.vector_store %arg4[%c0_19, %c0_20, %c0_21], %46 {strides = array<i32>} : memref<1x8x128xf32, #tpu.memory_space<vmem>>, vector<1x8x128xf32>,
    } else {
    }
    return
  }
  func.func @transform_0(%arg0: i32, %arg1: i32) -> (i32, i32) {
    %c1_i32 = arith.constant 1 : i32
    %0 = arith.muli %arg0, %c1_i32 : i32
    %1 = arith.addi %0, %arg1 : i32
    %c0_i32 = arith.constant 0 : i32
    %2 = arith.minsi %1, %c0_i32 : i32
    %c0_i32_0 = arith.constant 0 : i32
    %c0_i32_1 = arith.constant 0 : i32
    return %2, %c0_i32_0 : i32, i32
  }
  func.func @transform_1(%arg0: i32, %arg1: i32) -> (i32, i32) {
    %c1_i32 = arith.constant 1 : i32
    %0 = arith.muli %arg0, %c1_i32 : i32
    %1 = arith.addi %0, %arg1 : i32
    %c0_i32 = arith.constant 0 : i32
    %2 = arith.minsi %1, %c0_i32 : i32
    %c0_i32_0 = arith.constant 0 : i32
    %c0_i32_1 = arith.constant 0 : i32
    return %2, %c0_i32_0 : i32, i32
  }
  func.func @transform_2(%arg0: i32, %arg1: i32) -> (i32, i32, i32) {
    %c0_i32 = arith.constant 0 : i32
    %c0_i32_0 = arith.constant 0 : i32
    %c0_i32_1 = arith.constant 0 : i32
    return %arg0, %c0_i32, %c0_i32_0 : i32, i32, i32
  }
}

</mosaic_0001>

<bundles_post_ra>
// kernel: tpu_custom_call.1
= control target key start
LH: loop header
LB: loop body
LE: loop exit
PB: predicated region body
PF: predicated region fallthrough
CT: control target
= control target key end

     0   :  { %7 = vsyncpa [#allocation3], 0  ;;  %s286_s0 = inlined_call_operand.hbm [shape: f32[16,128], index: 0, kind: input, shape index: {}]   ;;  %s287_s1 = inlined_call_operand.hbm [shape: f32[16,128], index: 1, kind: input, shape index: {}]   ;;  %s288_s2 = inlined_call_operand.hbm [shape: f32[1,8,128], index: 2, kind: output, shape index: {}]  }
   0x1   :  { %8 = vsyncpa [#allocation6], 0 }
   0x2   :  { %9 = vsyncpa [#allocation4], 0  ;;  %s20_s11 = sshll.u32 %s286_s0, 4  ;;  %s257_s12 = smov [#allocation2]   ;;  %s21_s11 = int_to_ptr.hbm [resolvable:$true] %s20_s11 }
   0x3   :  { %s22_s13 = sshll.u32 %s257_s12, 4  ;;  %s39_s16 = sshll.u32 %s287_s1, 4  ;;  %s23_s13 = int_to_ptr.vmem [resolvable:$true] %s22_s13  ;;  %s40_s16 = int_to_ptr.hbm [resolvable:$true] %s39_s16 }
   0x4   :  { %s258_s17 = smov 128   ;;  %s259_s18 = smov 8  }
   0x5   :  { %28 = dma.hbm_to_vmem [thread:$0]  %s21_s11, 256, %s23_s13, [#allocation3], %s258_s17, %s258_s17, %s259_s18  }
   0x6   :  { %s260_s19 = smov [#allocation5]  }
   0x7   :  { %s41_s20 = sshll.u32 %s260_s19, 4  ;;  %s42_s20 = int_to_ptr.vmem [resolvable:$true] %s41_s20 }
   0x8   :  { %47 = dma.hbm_to_vmem [thread:$0]  %s40_s16, 256, %s42_s20, [#allocation6], %s258_s17, %s258_s17, %s259_s18  }
   0x9   :  { %251 = dma.done.wait [#allocation3], 256  }
   0xa   :  { %252 = vsyncadd [#allocation3], 4294967040 }
   0xb   :  { %253 = dma.done.wait [#allocation6], 256  }
   0xc   :  { %254 = vsyncadd [#allocation6], 4294967040  ;;  %v77_v0 = vld [vmem:[#allocation2] sm:$0xff]  ;;  %v78_v1 = vld [vmem:[#allocation2 + $0x8] sm:$0xff]  ;;  %s261_s0 = smov [#allocation7]   ;;  %s150_s23 = sshll.u32 %s288_s2, 4  ;;  %s151_s23 = int_to_ptr.hbm [resolvable:$true] %s150_s23 }
   0xd   :  { %v79_v2 = vld [vmem:[#allocation5] sm:$0xff]  ;;  %v80_v3 = vld [vmem:[#allocation5 + $0x8] sm:$0xff]  ;;  %v81_v4 = vadd.f32 1.0, %v77_v0  ;;  %v82_v5 = vadd.f32 1.0, %v78_v1  ;;  %s148_s1 = sshll.u32 %s261_s0, 4  ;;  %s149_s1 = int_to_ptr.vmem [resolvable:$true] %s148_s1 }
   0xe   :  { %v87_v6 = vadd.f32 1.0, %v79_v2  ;;  %v88_v7 = vadd.f32 1.0, %v80_v3 }
   0xf   :  { %171 = vlog2.f32 %v81_v4 }
  0x10   :  { %173 = vlog2.f32 %v82_v5 }
  0x11   :  { %175 = vlog2.f32 %v87_v6 }
  0x12   :  { %177 = vlog2.f32 %v88_v7 }
  0x15   :  { %v172_v8 = vpop.eup %171 }
  0x16   :  { %v174_v9 = vpop.eup %173  ;;  %v84_v10 = vmul.f32 0.6931472, %v172_v8 }
  0x17   :  { %v176_v11 = vpop.eup %175  ;;  %v86_v12 = vmul.f32 0.6931472, %v174_v9 }
  0x18   :  { %v178_v13 = vpop.eup %177  ;;  %v90_v14 = vmul.f32 0.6931472, %v176_v11 }
  0x19   :  { %v92_v15 = vmul.f32 0.6931472, %v178_v13 }
  0x1a   :  { %v93_v16 = vsub.f32 %v84_v10, %v90_v14 }
  0x1b   :  { %v94_v17 = vsub.f32 %v86_v12, %v92_v15 }
  0x1c   :  { %v95_v18 = vmul.f32 %v93_v16, %v93_v16 }
  0x1d   :  { %v96_v19 = vmul.f32 %v94_v17, %v94_v17 }
  0x1f   :  { %v97_v20 = vadd.f32 %v96_v19, %v95_v18 }
  0x21   :  { %100 = vst [vmem:[#allocation7] sm:$0xff] %v97_v20 }
  0x22   :  { %153 = dma.vmem_to_hbm [thread:$0]  %s149_s1, 128, %s151_s23, [#allocation4]  }
  0x23   :  { %255 = dma.done.wait [#allocation4], 128  }
  0x24   :  { %256 = vsyncadd [#allocation4], 4294967168 }
  0x25   :  { %158 = vsyncpa [#allocation3], 1 }
  0x26   :  { %159 = vsyncpa [#allocation6], 1 }
  0x27   :  { %160 = vsyncpa [#allocation4], 1 }

</bundles_post_ra>
